<compile_context>
chip_gen: v7x
topology: tpu7x:2x2x1
jax: 0.10.0
libtpu: 0.0.40
codegen_flags: <defaults>
</compile_context>

<pallas_src>
import jax
import jax.numpy as jnp
from jax.experimental import pallas as pl
from jax.experimental.pallas import tpu as pltpu


def additive_attention_kernel(keys_ref, q_ref, mask_ref, w_ref, bv_ref,
                              ctx_ref, sc_ref):
    """One batch block (TB batch elements) per grid step.

    keys_ref : (TB, S, 2E) f32  encoder hidden states (single HBM read, f32)
    q_ref    : (TB, D)     f32  last-layer decoder hidden state
    mask_ref : (TB, S)     f32  1.0 = keep, 0.0 = masked (lane-dense, S last)
    w_ref    : (2E+D, D)   bf16 atten weight, already transposed; rows [:2E] act on
                                keys, rows [2E:] act on the query
    bv_ref   : (2, D)      f32  row 0 = atten bias, row 1 = v weight row
    ctx_ref  : (TB, 2E)    f32  context vectors
    sc_ref   : (TB, S)     f32  attention probabilities (lane-dense)
    """
    TB, S, E2 = keys_ref.shape
    D = w_ref.shape[1]

    keys = keys_ref[...]                               # (TB, S, 2E) f32 (reused below)
    keys_bf = keys.astype(jnp.bfloat16)                # vreg-level cast for the MXU

    wk = w_ref[:E2, :]                                 # (2E, D) bf16  (static slice)
    wq = w_ref[E2:, :]                                 # (D,  D) bf16
    bv = bv_ref[...]                                   # (2, D) f32
    b_row = bv[0:1, :]                                 # (1, D) atten bias
    v_row = bv[1:2, :]                                 # (1, D) v weight row

    # Fused keys projection: one (TB*S, 2E) @ (2E, D) bf16 MXU matmul, f32 accumulate.
    hk = jnp.dot(keys_bf.reshape(TB * S, E2), wk,
                 preferred_element_type=jnp.float32)   # (TB*S, D)
    # Single query projection for the whole batch block: (TB, D) @ (D, D).
    hq = jnp.dot(q_ref[...].astype(jnp.bfloat16), wq,
                 preferred_element_type=jnp.float32)   # (TB, D)

    # cat(keys, query) @ W^T + b  ==  keys@Wk^T + query@Wq^T + b
    h = hk.reshape(TB, S, D) + hq[:, None, :] + b_row[None]
    h = jnp.tanh(h)                                    # (TB, S, D) f32

    # v projection: contract over D (lane axis) -> lane-dense (TB, S) raw scores.
    s = jnp.sum(h * v_row[None], axis=-1)              # (TB, S)

    # Masked softmax over the sequence axis (last dim -> lane reductions).
    s = jnp.where(mask_ref[...] == 0.0, jnp.float32(-1e30), s)
    m = jnp.max(s, axis=-1, keepdims=True)             # (TB, 1)
    e = jnp.exp(s - m)
    denom = jnp.sum(e, axis=-1, keepdims=True)         # (TB, 1)
    r = pl.reciprocal(denom, approx=True)              # EUP reciprocal (free slot)
    r = r * (2.0 - denom * r)                          # one Newton step -> ~f32 exact
    p = e * r                                          # (TB, S)

    # Context on the VPU/XLU path: broadcast-mul + reduce over S.  Avoids TB tiny
    # M=1 MXU matmuls and reuses the f32 keys already in vregs (no up-cast copy).
    ctx = jnp.sum(p[:, :, None] * keys, axis=1)        # (TB, 2E) f32

    ctx_ref[...] = ctx
    sc_ref[...] = p


def additive_attention(keys, query, mask, w_atten, b_atten, w_v, *, block_b=None):
    """Pallas-backed forward. Returns (context (B, 2E) f32, atten_scores (B, S) f32).

    keys    : (B, S, 2E) f32
    query   : (L, B, D)  f32   (only the last layer is used, as in the PyTorch module)
    mask    : (B, S)           zeros/ones
    w_atten : (D, 2E+D)  f32   nn.Linear(2E+D -> D).weight
    b_atten : (D,)       f32   nn.Linear bias
    w_v     : (1, D)     f32   nn.Linear(D -> 1, bias=False).weight
    """
    B, S, E2 = keys.shape
    D = w_atten.shape[0]
    assert w_atten.shape[1] == E2 + D

    # --- block_b heuristic -------------------------------------------------------
    # Keep >= 2 parallel grid steps when B allows (v7x has 2 TensorCores), and keep
    # the per-step footprint under a conservative ~12 MiB budget so it fits v5e's
    # 16 MiB scoped-VMEM default and v7x's 64 MiB physical VMEM with double-buffering
    # headroom, without needing vmem_limit_bytes overrides.
    def footprint(tb):
        keys_bytes = tb * S * E2 * 4 * 2          # f32 keys tile, double-buffered
        interm = tb * S * D * 4 * 3               # hk / h / products headroom
        small = tb * (D + S) * 4 * 2              # q, mask tiles (double-buffered)
        outs = tb * (E2 + S) * 4 * 2              # ctx, sc tiles
        return keys_bytes + interm + small + outs

    if block_b is None:
        block_b = B
        if B >= 16 and (B // 2) % 8 == 0:
            block_b = B // 2                      # >= 2 steps -> both v7x TCs get work
        vmem_budget = 12 * 1024 * 1024
        while footprint(block_b) > vmem_budget and block_b % 16 == 0:
            block_b //= 2
    assert B % block_b == 0 and (block_b == B or block_b % 8 == 0), (
        "block_b must divide B and (if < B) be a multiple of 8")
    num_blocks = B // block_b

    # --- pack parameters (fewer DMA streams, all resident across the grid) --------
    keys_f = keys.astype(jnp.float32)             # single f32 HBM stream for keys
    q_f = query[-1].astype(jnp.float32)           # (B, D) last decoder layer
    mask_f = mask.astype(jnp.float32)             # (B, S) lane-dense
    w_packed = w_atten.T.astype(jnp.bfloat16)     # (2E+D, D): rows [:2E]=Wk^T, [2E:]=Wq^T
    bv = jnp.stack([b_atten.astype(jnp.float32),
                    w_v.reshape(D).astype(jnp.float32)], axis=0)  # (2, D)

    out_shapes = (
        jax.ShapeDtypeStruct((B, E2), jnp.float32),
        jax.ShapeDtypeStruct((B, S), jnp.float32),
    )

    ctx, sc = pl.pallas_call(
        additive_attention_kernel,
        out_shape=out_shapes,
        grid=(num_blocks,),
        in_specs=[
            pl.BlockSpec((block_b, S, E2), lambda i: (i, 0, 0)),   # keys (f32)
            pl.BlockSpec((block_b, D), lambda i: (i, 0)),          # query (last layer)
            pl.BlockSpec((block_b, S), lambda i: (i, 0)),          # mask (lane-dense)
            pl.BlockSpec((E2 + D, D), lambda i: (0, 0)),           # packed W^T (resident)
            pl.BlockSpec((2, D), lambda i: (0, 0)),                # bias + v (resident)
        ],
        out_specs=(
            pl.BlockSpec((block_b, E2), lambda i: (i, 0)),
            pl.BlockSpec((block_b, S), lambda i: (i, 0)),
        ),
        compiler_params=pltpu.CompilerParams(dimension_semantics=("parallel",)),
    )(keys_f, q_f, mask_f, w_packed, bv)

    return ctx, sc


def additive_attention_ref(keys, query, mask, w_atten, b_atten, w_v):
    """Pure-JAX f32 reference mirroring the PyTorch forward exactly."""
    B, S, E2 = keys.shape
    q = query[-1]                                          # (B, D)
    qr = jnp.repeat(q[:, None, :], S, axis=1)              # (B, S, D)
    atten_in = jnp.concatenate([keys, qr], axis=2)         # (B, S, 2E+D)
    h = jnp.tanh(jnp.einsum('bsk,dk->bsd', atten_in, w_atten,
                            precision=jax.lax.Precision.HIGHEST) + b_atten)
    scores = jnp.einsum('bsd,d->bs', h, w_v[0],
                        precision=jax.lax.Precision.HIGHEST)
    scores = jnp.where(mask == 0, -jnp.inf, scores)
    scores = jax.nn.softmax(scores, axis=1)
    ctx = jnp.einsum('bse,bs->be', keys, scores,
                     precision=jax.lax.Precision.HIGHEST)
    return ctx, scores


if __name__ == "__main__":
    # Module hyperparams implied by __init__: encoder_hidd_dim, decoder_hidd_dim.
    encoder_hidd_dim = 16
    decoder_hidd_dim = 32
    E2 = encoder_hidd_dim * 2          # keys feature dim (bidirectional encoder)
    D = decoder_hidd_dim
    B, S, L = 2, 8, 2                  # batch, src_seq_length, decoder layers

    key = jax.random.PRNGKey(0)
    k1, k2, k3, k4, k5 = jax.random.split(key, 5)

    keys_in = jax.random.normal(k1, (B, S, E2), dtype=jnp.float32)
    query_in = jax.random.normal(k2, (L, B, D), dtype=jnp.float32)
    # mask of zeros/ones (pad positions = 0), per-batch lengths 8 and 5
    lengths = jnp.array([8, 5])
    mask_in = (jnp.arange(S)[None, :] < lengths[:, None]).astype(jnp.float32)

    # Deterministic parameter init (shapes from nn.Linear in __init__):
    #   atten: Linear(2E + D -> D)  -> weight (D, 2E+D), bias (D,)
    #   v    : Linear(D -> 1, bias=False) -> weight (1, D)
    bound_a = 1.0 / jnp.sqrt(E2 + D)
    W_atten = jax.random.uniform(k3, (D, E2 + D), jnp.float32, -bound_a, bound_a)
    b_atten = jax.random.uniform(k4, (D,), jnp.float32, -bound_a, bound_a)
    bound_v = 1.0 / jnp.sqrt(D)
    W_v = jax.random.uniform(k5, (1, D), jnp.float32, -bound_v, bound_v)

    ctx, scores = additive_attention(keys_in, query_in, mask_in, W_atten, b_atten, W_v)
    jax.block_until_ready((ctx, scores))

    # (1) Validate against the TRUE f32 PyTorch-equivalent forward (loose tolerance
    #     covering the deliberate bf16 MXU inputs for the projection matmuls).
    ctx_r, sc_r = additive_attention_ref(keys_in, query_in, mask_in,
                                         W_atten, b_atten, W_v)
    assert jnp.allclose(ctx, ctx_r, atol=1e-2, rtol=1e-2), \
        float(jnp.max(jnp.abs(ctx - ctx_r)))
    assert jnp.allclose(scores, sc_r, atol=1e-2, rtol=1e-2), \
        float(jnp.max(jnp.abs(scores - sc_r)))

    # (2) Tight check against a reference evaluated on the same bf16-quantized matmul
    #     inputs the kernel uses (isolates kernel structure from the precision trade).
    bf = lambda x: x.astype(jnp.bfloat16).astype(jnp.float32)
    ctx_q, sc_q = additive_attention_ref(keys_in, query_in, mask_in,
                                         bf(W_atten), b_atten, W_v)
    assert jnp.allclose(ctx, ctx_q, atol=2e-3, rtol=2e-3), \
        float(jnp.max(jnp.abs(ctx - ctx_q)))
    assert jnp.allclose(scores, sc_q, atol=2e-3, rtol=2e-3), \
        float(jnp.max(jnp.abs(scores - sc_q)))

    print("KERNEL_OK")
</pallas_src>

<mosaic_0001>
module attributes {stable_mosaic.version = 11 : i64} {
  func.func @additive_attention_kernel(%arg0: i32, %arg1: memref<2x8x32xf32, #tpu.memory_space<vmem>>, %arg2: memref<2x32xf32, #tpu.memory_space<vmem>>, %arg3: memref<2x8xf32, #tpu.memory_space<vmem>>, %arg4: memref<64x32xbf16, #tpu.memory_space<vmem>>, %arg5: memref<2x32xf32, #tpu.memory_space<vmem>>, %arg6: memref<2x32xf32, #tpu.memory_space<vmem>>, %arg7: memref<2x8xf32, #tpu.memory_space<vmem>>) attributes {dimension_semantics = [#tpu.dimension_semantics<parallel>], iteration_bounds = array<i64: 1>, scalar_prefetch = 0 : i64, scratch_operands = 0 : i64, tpu.core_type = #tpu.core_type<tc>, window_params = [{transform_indices = @transform_0, window_bounds = array<i64: 2, 8, 32>}, {transform_indices = @transform_1, window_bounds = array<i64: 2, 32>}, {transform_indices = @transform_2, window_bounds = array<i64: 2, 8>}, {pipeline_mode = #tpu.pipeline_mode<synchronous>, transform_indices = @transform_3, window_bounds = array<i64: 64, 32>}, {pipeline_mode = #tpu.pipeline_mode<synchronous>, transform_indices = @transform_4, window_bounds = array<i64: 2, 32>}, {transform_indices = @transform_5, window_bounds = array<i64: 2, 32>}, {transform_indices = @transform_6, window_bounds = array<i64: 2, 8>}]} {
    %c0 = arith.constant 0 : index
    %c0_0 = arith.constant 0 : index
    %c0_1 = arith.constant 0 : index
    %0 = vector.load %arg1[%c0, %c0_0, %c0_1] : memref<2x8x32xf32, #tpu.memory_space<vmem>>, vector<2x8x32xf32>
    %1 = arith.truncf %0 : vector<2x8x32xf32> to vector<2x8x32xbf16>
    %c0_2 = arith.constant 0 : index
    %c0_3 = arith.constant 0 : index
    %2 = vector.load %arg4[%c0_2, %c0_3] : memref<64x32xbf16, #tpu.memory_space<vmem>>, vector<32x32xbf16>
    %c32 = arith.constant 32 : index
    %c0_4 = arith.constant 0 : index
    %3 = vector.load %arg4[%c32, %c0_4] : memref<64x32xbf16, #tpu.memory_space<vmem>>, vector<32x32xbf16>
    %c0_5 = arith.constant 0 : index
    %c0_6 = arith.constant 0 : index
    %4 = vector.load %arg5[%c0_5, %c0_6] : memref<2x32xf32, #tpu.memory_space<vmem>>, vector<2x32xf32>
    %5 = vector.extract_strided_slice %4 {offsets = [0, 0], sizes = [1, 32], strides = [1, 1]} : vector<2x32xf32> to vector<1x32xf32>
    %6 = vector.extract_strided_slice %4 {offsets = [1, 0], sizes = [1, 32], strides = [1, 1]} : vector<2x32xf32> to vector<1x32xf32>
    %7 = vector.shape_cast %1 : vector<2x8x32xbf16> to vector<16x32xbf16>
    %cst = arith.constant dense<0.000000e+00> : vector<16x32xf32>
    %8 = tpu.matmul %7, %2, %cst {dimension_numbers = #tpu.dot_dimension_numbers<[1], [0], [0], [1], [0, 0, 1, 1], [], []>} : vector<16x32xbf16>, vector<32x32xbf16>, vector<16x32xf32> -> vector<16x32xf32>
    %c0_7 = arith.constant 0 : index
    %c0_8 = arith.constant 0 : index
    %9 = vector.load %arg2[%c0_7, %c0_8] : memref<2x32xf32, #tpu.memory_space<vmem>>, vector<2x32xf32>
    %10 = arith.truncf %9 : vector<2x32xf32> to vector<2x32xbf16>
    %cst_9 = arith.constant dense<0.000000e+00> : vector<2x32xf32>
    %11 = tpu.matmul %10, %3, %cst_9 {dimension_numbers = #tpu.dot_dimension_numbers<[1], [0], [0], [1], [0, 0, 1, 1], [], []>} : vector<2x32xbf16>, vector<32x32xbf16>, vector<2x32xf32> -> vector<2x32xf32>
    %12 = vector.shape_cast %8 : vector<16x32xf32> to vector<2x8x32xf32>
    %13 = vector.shape_cast %11 : vector<2x32xf32> to vector<2x1x32xf32>
    %14 = vector.broadcast %13 : vector<2x1x32xf32> to vector<2x8x32xf32>
    %15 = arith.addf %12, %14 : vector<2x8x32xf32>
    %16 = vector.shape_cast %5 : vector<1x32xf32> to vector<1x1x32xf32>
    %17 = vector.broadcast %16 : vector<1x1x32xf32> to vector<2x8x32xf32>
    %18 = arith.addf %15, %17 : vector<2x8x32xf32>
    %19 = math.tanh %18 : vector<2x8x32xf32>
    %20 = vector.shape_cast %6 : vector<1x32xf32> to vector<1x1x32xf32>
    %21 = vector.broadcast %20 : vector<1x1x32xf32> to vector<2x8x32xf32>
    %22 = arith.mulf %19, %21 : vector<2x8x32xf32>
    %cst_10 = arith.constant dense<0.000000e+00> : vector<2x8xf32>
    %23 = vector.multi_reduction <add>, %22, %cst_10 [2] : vector<2x8x32xf32> to vector<2x8xf32>
    %c0_11 = arith.constant 0 : index
    %c0_12 = arith.constant 0 : index
    %24 = vector.load %arg3[%c0_11, %c0_12] : memref<2x8xf32, #tpu.memory_space<vmem>>, vector<2x8xf32>
    %cst_13 = arith.constant 0.000000e+00 : f32
    %25 = vector.broadcast %cst_13 : f32 to vector<2x8xf32>
    %26 = arith.cmpf oeq, %24, %25 : vector<2x8xf32>
    %cst_14 = arith.constant -1.000000e+30 : f32
    %27 = vector.broadcast %cst_14 : f32 to vector<2x8xf32>
    %28 = arith.select %26, %27, %23 : vector<2x8xi1>, vector<2x8xf32>
    %cst_15 = arith.constant dense<0xFF800000> : vector<2xf32>
    %29 = vector.multi_reduction <maximumf>, %28, %cst_15 [1] : vector<2x8xf32> to vector<2xf32>
    %30 = vector.shape_cast %29 : vector<2xf32> to vector<2x1xf32>
    %31 = vector.broadcast %30 : vector<2x1xf32> to vector<2x8xf32>
    %32 = arith.subf %28, %31 : vector<2x8xf32>
    %33 = math.exp %32 : vector<2x8xf32>
    %cst_16 = arith.constant dense<0.000000e+00> : vector<2xf32>
    %34 = vector.multi_reduction <add>, %33, %cst_16 [1] : vector<2x8xf32> to vector<2xf32>
    %35 = vector.shape_cast %34 : vector<2xf32> to vector<2x1xf32>
    %36 = tpu.reciprocal %35 {approx = true} : vector<2x1xf32> -> vector<2x1xf32>
    %37 = arith.mulf %35, %36 : vector<2x1xf32>
    %cst_17 = arith.constant 2.000000e+00 : f32
    %38 = vector.broadcast %cst_17 : f32 to vector<2x1xf32>
    %39 = arith.subf %38, %37 : vector<2x1xf32>
    %40 = arith.mulf %36, %39 : vector<2x1xf32>
    %41 = vector.broadcast %40 : vector<2x1xf32> to vector<2x8xf32>
    %42 = arith.mulf %33, %41 : vector<2x8xf32>
    %43 = vector.shape_cast %42 : vector<2x8xf32> to vector<2x8x1xf32>
    %44 = vector.broadcast %43 : vector<2x8x1xf32> to vector<2x8x32xf32>
    %45 = arith.mulf %44, %0 : vector<2x8x32xf32>
    %cst_18 = arith.constant dense<0.000000e+00> : vector<2x32xf32>
    %46 = vector.multi_reduction <add>, %45, %cst_18 [1] : vector<2x8x32xf32> to vector<2x32xf32>
    %c0_19 = arith.constant 0 : index
    %c0_20 = arith.constant 0 : index
    %47 = vector.load %arg6[%c0_19, %c0_20] : memref<2x32xf32, #tpu.memory_space<vmem>>, vector<2x32xf32>
    tpu.vector_store %arg6[%c0_19, %c0_20], %46 {strides = array<i32>} : memref<2x32xf32, #tpu.memory_space<vmem>>, vector<2x32xf32>,
    %c0_21 = arith.constant 0 : index
    %c0_22 = arith.constant 0 : index
    %48 = vector.load %arg7[%c0_21, %c0_22] : memref<2x8xf32, #tpu.memory_space<vmem>>, vector<2x8xf32>
    tpu.vector_store %arg7[%c0_21, %c0_22], %42 {strides = array<i32>} : memref<2x8xf32, #tpu.memory_space<vmem>>, vector<2x8xf32>,
    return
  }
  func.func @transform_0(%arg0: i32) -> (i32, i32, i32) {
    %c0_i32 = arith.constant 0 : i32
    %c0_i32_0 = arith.constant 0 : i32
    %c0_i32_1 = arith.constant 0 : i32
    return %arg0, %c0_i32, %c0_i32_0 : i32, i32, i32
  }
  func.func @transform_1(%arg0: i32) -> (i32, i32) {
    %c0_i32 = arith.constant 0 : i32
    %c0_i32_0 = arith.constant 0 : i32
    return %arg0, %c0_i32 : i32, i32
  }
  func.func @transform_2(%arg0: i32) -> (i32, i32) {
    %c0_i32 = arith.constant 0 : i32
    %c0_i32_0 = arith.constant 0 : i32
    return %arg0, %c0_i32 : i32, i32
  }
  func.func @transform_3(%arg0: i32) -> (i32, i32) {
    %c0_i32 = arith.constant 0 : i32
    %c0_i32_0 = arith.constant 0 : i32
    %c0_i32_1 = arith.constant 0 : i32
    return %c0_i32, %c0_i32_0 : i32, i32
  }
  func.func @transform_4(%arg0: i32) -> (i32, i32) {
    %c0_i32 = arith.constant 0 : i32
    %c0_i32_0 = arith.constant 0 : i32
    %c0_i32_1 = arith.constant 0 : i32
    return %c0_i32, %c0_i32_0 : i32, i32
  }
  func.func @transform_5(%arg0: i32) -> (i32, i32) {
    %c0_i32 = arith.constant 0 : i32
    %c0_i32_0 = arith.constant 0 : i32
    return %arg0, %c0_i32 : i32, i32
  }
  func.func @transform_6(%arg0: i32) -> (i32, i32) {
    %c0_i32 = arith.constant 0 : i32
    %c0_i32_0 = arith.constant 0 : i32
    return %arg0, %c0_i32 : i32, i32
  }
}

</mosaic_0001>

<bundles_post_ra>
// kernel: tpu_custom_call.1
= control target key start
LH: loop header
LB: loop body
LE: loop exit
PB: predicated region body
PF: predicated region fallthrough
CT: control target
= control target key end

     0   :  { %12 = vsyncpa [#allocation3], 0  ;;  %v405_v1 = vmov 0.0   ;;  %vm406_vm0 = vmmov 0   ;;  %s521_s0 = inlined_call_operand.vmem [shape: f32[2,8,32], index: 0, kind: input, shape index: {}]   ;;  %s522_s1 = inlined_call_operand.vmem [shape: f32[2,32], index: 1, kind: input, shape index: {}]   ;;  %s523_s2 = inlined_call_operand.vmem [shape: f32[2,8], index: 2, kind: input, shape index: {}]   ;;  %s524_s3 = inlined_call_operand.vmem [shape: bf16[64,32], index: 3, kind: input, shape index: {}]   ;;  %s525_s4 = inlined_call_operand.vmem [shape: f32[2,32], index: 4, kind: input, shape index: {}]   ;;  %s526_s5 = inlined_call_operand.hbm [shape: f32[2,32], index: 5, kind: output, shape index: {0}]   ;;  %s527_s6 = inlined_call_operand.hbm [shape: f32[2,8], index: 6, kind: output, shape index: {1}]  }
   0x1   :  { %v345_v0 = vld [vmem:[%s524_s3 + $0x10] sm:$0xff]   ;;  %332 = vmatprep.subr.bf16.mxu1 %v405_v1  ;;  %324 = vmatprep.subr.bf16.mxu0 %v405_v1  ;;  %v346_v2 = vld [vmem:[%s524_s3] sm:$0xff]   ;;  %v347_v3 = vld [vmem:[%s524_s3 + $0x18] sm:$0xff]  }
   0x2   :  { %333 = vmatpush3.bf16.msra.mxu1 %v345_v0  ;;  %336 = vmatprep.mubr.msk.bf16.mxu1 %vm406_vm0, %v405_v1  ;;  %v348_v4 = vld [vmem:[%s524_s3 + $0x8] sm:$0xff]   ;;  %v100_v5 = vld [vmem:[%s522_s1] sm:$0x3] }
   0x3   :  { %325 = vmatpush3.bf16.msra.mxu0 %v346_v2  ;;  %334 = vmatprep.subr.bf16.mxu1 %v405_v1  ;;  %v463_v6 = vld [vmem:[%s521_s0] sm:$0xff]  ;;  %v468_v7 = vld [vmem:[%s521_s0 + $0x8] sm:$0xff]  ;;  %v101_v8 = vpack.c.bf16 %v100_v5, %v100_v5 }
   0x4   :  { %326 = vmatprep.subr.bf16.mxu0 %v405_v1  ;;  %328 = vmatprep.mubr.msk.bf16.mxu0 %vm406_vm0, %v405_v1 }
   0x5   :  { %13 = vsyncpa [#allocation5], 0  ;;  %vm55_vm1 = vcmask 261120   ;;  %v317_v9 = vpack.c.bf16 %v468_v7, %v463_v6  ;;  %v161_v10 = vlaneseq  ;;  %v407_v14 = vmov 1966171168  }
   0x6   :  { %335 = vmatpush3.bf16.msra.mxu1 %v347_v3  ;;  %v159_v15 = vunpack.c.l.s4 %v407_v14  ;;  %v37_v24 = vld [vmem:[%s525_s4] sm:$0x3]  ;;  %vm226_vm2 = vcmask 1041409   ;;  %vm230_vm4 = vcmask 58368  }
   0x7   :  { %327 = vmatpush3.bf16.msra.mxu0 %v348_v4  ;;  %v474_v11 = vshrl.u32 %v161_v10, 7  ;;  %v217_v12 = vand.u32 127, %v161_v10  ;;  %v212_v48 = vld [vmem:[%s523_s2] sm:$0x3]  ;;  %s408_s2 = smov [#allocation4]  }
   0x8   :  { %v160_v16 = vunpack.c.0.s8 %v159_v15  ;;  %vm213_vm3 = vcmp.eq.f32.partialorder %v212_v48, 0.0  ;;  %s298_s11 = sshll.u32 %s408_s2, 4  ;;  %s299_s11 = int_to_ptr.vmem [resolvable:$true] %s298_s11 }
   0x9   :  { %337 = vmatmul.mubr.msk.bf16.vlgmr.msra.gmra.mrb[0].mxu1 %vm55_vm1, %v101_v8  ;;  %v220_v13 = vsub.s32 %v217_v12, %v474_v11  ;;  %v182_v22 = vsub.s32 0, %v474_v11  ;;  %v202_v39 = vsub.s32 1, %v474_v11  ;;  %s357_s12 = scalar_lea.vmem %s299_s11, 32  ;;  %p362_p1 = scmp.lt.s32.totalorder %s299_s11, %s299_s11 }
   0xa   :  { %329 = vmatmul.mubr.msk.bf16.vlgmr.msra.gmra.mrb[0].mxu0 %vm55_vm1, %v317_v9  ;;  %v163_v17 = vsub.s32 %v160_v16, %v474_v11  ;;  %p358_p0 = scmp.ne.s32.totalorder %s299_s11, %s357_s12  ;;  %p363_p2 = scmp.lt.s32.totalorder %s357_s12, %s357_s12 }
   0xb   :  { %v195_v32 = vrot.slane %v37_v24, %v182_v22  ;;  %v203_v40 = vrot.slane %v37_v24, %v202_v39 }
   0xc   :  { %p364_p3 = por %p363_p2, %p362_p1 }
   0xe   :  { %p365_p4 = pnand %p364_p3, %p358_p0 }
  0xdc   :  { %v151_v18 = vpop.f32.mrb[0].mxu1 }
  0xdd   :  { %v164_v19 = vrot.slane %v151_v18, %v163_v17  ;;  %v338_v20 = vpop.f32.mrb[1].mxu1  ;;  %v93_v21 = vpop.f32.mrb[0].mxu0 }
  0xde   :  { %v154_v23 = vpop.f32.mrb[2].mxu1  ;;  %v330_v25 = vpop.f32.mrb[1].mxu0 }
  0xdf   :  { %v165_v26 = vcombine.high %v164_v19, %v164_v19  ;;  %v172_v27 = vrot.slane %v164_v19, %v163_v17  ;;  %v339_v28 = vpop.f32.mrb[3].mxu1  ;;  %v96_v29 = vpop.f32.mrb[2].mxu0 }
  0xe0   :  { %v331_v30 = vpop.f32.mrb[3].mxu0 }
  0xe1   :  { %v183_v31 = vrot.slane %v172_v27, %v182_v22  ;;  %v179_v33 = vrot.slane %v165_v26, %v163_v17 }
  0xe3   :  { %v190_v34 = vadd.f32 %v183_v31, %v93_v21  ;;  %v187_v35 = vrot.slane %v179_v33, %v182_v22 }
  0xe5   :  { %v196_v36 = vadd.f32 %v195_v32, %v190_v34  ;;  %v191_v37 = vadd.f32 %v187_v35, %v96_v29 }
  0xe7   :  { %349 = vtanh.f32 %v196_v36  ;;  %v197_v38 = vadd.f32 %v195_v32, %v191_v37 }
  0xe9   :  { %351 = vtanh.f32 %v197_v38 }
  0xf1   :  { %v350_v41 = vpop.eup %349 }
  0xf2   :  { %v204_v42 = vmul.f32 %v350_v41, %v203_v40 }
  0xf3   :  { %v352_v43 = vpop.eup %351 }
  0xf4   :  { %v206_v44 = vsel %vm55_vm1, %v204_v42, 0.0  ;;  %v205_v45 = vmul.f32 %v352_v43, %v203_v40 }
  0xf5   :  { %207 = vadd.xlane.f32.xlu0 %v206_v44 }
  0xf6   :  { %v209_v46 = vsel %vm55_vm1, %v205_v45, 0.0 }
  0xf9   :  { %210 = vadd.xlane.f32.xlu0 %v209_v46 }
 0x182   :  { %v208_v47 = vpop.xlane.xlu0 %207 }
 0x183   :  { %v221_v50 = vrot.slane %v208_v47, %v220_v13 }
 0x186   :  { %v211_v49 = vpop.xlane.xlu0 %210 }
 0x187   :  { %v225_v51 = vrot.slane %v211_v49, %v220_v13 }
 0x189   :  { %v227_v52 = vsel %vm226_vm2, %v225_v51, %v221_v50 }
 0x18a   :  { %v229_v53 = vsel %vm213_vm3, -1e+30, %v227_v52 }
 0x18b   :  { %v231_v54 = vsel %vm230_vm4, %v229_v53, -inf }
 0x18c   :  { %232 = vmax.xlane.f32.xlu1 %v231_v54 }
 0x219   :  { %v233_v55 = vpop.xlane.xlu1 %232 }
 0x21a   :  { %v234_v56 = vsub.f32 %v229_v53, %v233_v55 }
 0x21c   :  { %v235_v57 = vmul.f32 1.442695, %v234_v56 }
 0x21e   :  { %353 = vpow2.f32 %v235_v57 }
 0x228   :  { %v354_v58 = vpop.eup %353 }
 0x229   :  { %v237_v59 = vsel %vm230_vm4, %v354_v58, 0.0 }
 0x22a   :  { %238 = vadd.xlane.f32.xlu1 %v237_v59 }
 0x2b7   :  { %v239_v60 = vpop.xlane.xlu1 %238 }
 0x2b8   :  { %355 = vrcp.f32 %v239_v60 }
 0x2c2   :  { %v356_v61 = vpop.eup %355 }
 0x2c3   :  { %v241_v62 = vmul.f32 %v356_v61, %v239_v60 }
 0x2c5   :  { %v242_v63 = vsub.f32 2.0, %v241_v62 }
 0x2c7   :  { %v243_v0 = vmul.f32 %v356_v61, %v242_v63 }
 0x2c9   :  { %v244_v1 = vmul.f32 %v354_v58, %v243_v0 }
 0x2cb   :  { %v255_v2 = vrot.slane %v244_v1, %v202_v39  ;;  %281 = vst.msk [vmem:[#allocation4] sm:$0x3] %vm230_vm4, %v244_v1  ;;  %v248_v3 = vrot.slane %v244_v1, %v182_v22 }
 0x2cd   :  { %257 = vbcast.lane.b32.xlu1 %v255_v2, 256  ;;  %250 = vbcast.lane.b32.xlu0 %v248_v3, 256 }
 0x2ce   :  { %368 = shalt.err (!%p365_p4)
}
 0x2cf   :  { %s369_s15 = scalar_lea.hbm %s527_s6, 32 }
 0x2d0   :  { %p370_p5 = scmp.ne.s32.totalorder %s527_s6, %s369_s15  ;;  %p373_p6 = scmp.lt.u32.totalorder %s369_s15, %s527_s6 }
 0x2d2   :  { %p375_p7 = pnand %p373_p6, %p370_p5 }
 0x2d4   :  { %378 = shalt.err (!%p375_p7)
}
 0x2d5   :  { %301 = dma.vmem_to_hbm [thread:$0]  %s299_s11, 32, %s527_s6, [#allocation5]   ;;  %vm279_vm5 = vcmask 254976  }
 0x2d6   :  { %s409_s6 = smov [#allocation2]  }
 0x2d7   :  { %s288_s22 = sshll.u32 %s409_s6, 4  ;;  %s289_s22 = int_to_ptr.vmem [resolvable:$true] %s288_s22 }
 0x2d8   :  { %s379_s23 = scalar_lea.vmem %s289_s22, 32  ;;  %p384_p9 = scmp.lt.s32.totalorder %s289_s22, %s289_s22 }
 0x2d9   :  { %p380_p8 = scmp.ne.s32.totalorder %s289_s22, %s379_s23  ;;  %p385_p10 = scmp.lt.s32.totalorder %s379_s23, %s379_s23 }
 0x2db   :  { %p386_p11 = por %p385_p10, %p384_p9 }
 0x2dd   :  { %p387_p12 = pnand %p386_p11, %p380_p8 }
 0x33f   :  { %v258_v4 = vpop.permute.xlu1 %257  ;;  %v251_v5 = vpop.permute.xlu0 %250 }
 0x340   :  { %v260_v8 = vmul.f32 %v258_v4, %v468_v7  ;;  %v259_v9 = vmul.f32 %v251_v5, %v463_v6 }
 0x342   :  { %v268_v10 = vsel %vm55_vm1, %v260_v8, 0.0  ;;  %v261_v11 = vsel %vm55_vm1, %v259_v9, 0.0 }
 0x343   :  { %v269_v12 = vrot.slane %v268_v10, 4  ;;  %v262_v13 = vrot.slane %v261_v11, 4 }
 0x345   :  { %v270_v14 = vadd.f32 %v269_v12, %v268_v10  ;;  %v263_v15 = vadd.f32 %v262_v13, %v261_v11 }
 0x347   :  { %v271_v16 = vrot.slane %v270_v14, 2  ;;  %v264_v17 = vrot.slane %v263_v15, 2 }
 0x349   :  { %v272_v18 = vadd.f32 %v271_v16, %v270_v14  ;;  %v265_v19 = vadd.f32 %v264_v17, %v263_v15 }
 0x34b   :  { %v273_v20 = vrot.slane %v272_v18, 1  ;;  %v266_v21 = vrot.slane %v265_v19, 1 }
 0x34d   :  { %v267_v22 = vadd.f32 %v266_v21, %v265_v19  ;;  %v274_v7 = vadd.f32 %v273_v20, %v272_v18 }
 0x34f   :  { %v277_v6 = vsel %vm226_vm2, %v274_v7, %v267_v22 }
 0x350   :  { %280 = vst.msk [vmem:[#allocation2] sm:$0x3] %vm279_vm5, %v277_v6 }
 0x351   :  { %390 = shalt.err (!%p387_p12)
}
 0x352   :  { %s391_s26 = scalar_lea.hbm %s526_s5, 32 }
 0x353   :  { %p392_p13 = scmp.ne.s32.totalorder %s526_s5, %s391_s26  ;;  %p395_p0 = scmp.lt.u32.totalorder %s391_s26, %s526_s5 }
 0x355   :  { %p397_p1 = pnand %p395_p0, %p392_p13 }
 0x357   :  { %400 = shalt.err (!%p397_p1)
}
 0x358   :  { %291 = dma.vmem_to_hbm [thread:$0]  %s289_s22, 32, %s526_s5, [#allocation3]  }
 0x359   :  { %401 = dma.done.wait [#allocation3], 32  }
 0x35a   :  { %402 = vsyncadd [#allocation3], 4294967264 }
 0x35b   :  { %403 = dma.done.wait [#allocation5], 32  }
 0x35c   :  { %404 = vsyncadd [#allocation5], 4294967264 }
 0x35d   :  { %308 = vsyncpa [#allocation3], 1 }
 0x35e   :  { %309 = vsyncpa [#allocation5], 1 }

</bundles_post_ra>
